<compile_context>
chip_gen: v7x
topology: tpu7x:2x2x1
jax: 0.10.0
libtpu: 0.0.40
codegen_flags: <defaults>
</compile_context>

<pallas_src>
import functools
import math

import jax
import jax.numpy as jnp
from jax.experimental import pallas as pl
from jax.experimental.pallas import tpu as pltpu


def _dft_cos_sin(n):
    """Real/imag parts of the (symmetric) DFT matrix exp(-2*pi*i*k*m/n)."""
    k = jnp.arange(n, dtype=jnp.int32)
    km = (k[:, None] * k[None, :]) % n                    # keep angles in [0, 2*pi)
    ang = (2.0 * math.pi / n) * km.astype(jnp.float32)
    return jnp.cos(ang), jnp.sin(ang)                     # (n, n) float32 each


def _fnet_kernel(x_ref, w1_ref, w2_ref, o_ref, t_ref, *, chunk_rows):
    """One grid step over Nb batch elements.

    x_ref : (Nb, S, D)   input slab (compute dtype)
    w1_ref: (D, 2D)      [C_D | S_D]   stage-1 (dim=-1) DFT weight, fused
    w2_ref: (S, 2S)      [C_S | -S_S]  stage-2 (dim=-2) DFT weight, fused
    o_ref : (Nb, S, D)   Re(FFT2) output
    t_ref : (Nb, 2S, D)  VMEM scratch; per batch rows [0:S] = x@C_D, [S:2S] = x@S_D
    """
    Nb, S, D = x_ref.shape
    w1 = w1_ref[...]

    # ---- Stage 1: DFT along dim=-1, chunked fused matmuls staged to VMEM ----
    if chunk_rows >= S:
        bc = chunk_rows // S                      # whole batch elements per chunk
        for c in range(Nb // bc):                 # small static chunk count
            b0 = c * bc
            xc = x_ref[b0:b0 + bc].reshape(bc * S, D)
            t = jnp.dot(xc, w1, preferred_element_type=jnp.float32)   # (bc*S, 2D)
            t = t.astype(t_ref.dtype)
            # lane-split at the D boundary (vreg aligned) -> row-stack per batch
            t_ref[b0:b0 + bc, :S, :] = t[:, :D].reshape(bc, S, D)
            t_ref[b0:b0 + bc, S:, :] = t[:, D:].reshape(bc, S, D)
    else:
        per_b = S // chunk_rows                   # chunks per batch element
        for c in range(Nb * per_b):
            b, s0 = c // per_b, (c % per_b) * chunk_rows
            xc = x_ref[b, s0:s0 + chunk_rows, :]
            t = jnp.dot(xc, w1, preferred_element_type=jnp.float32)
            t = t.astype(t_ref.dtype)             # (chunk_rows, 2D)
            t_ref[b, s0:s0 + chunk_rows, :] = t[:, :D]
            t_ref[b, S + s0:S + s0 + chunk_rows, :] = t[:, D:]

    # ---- Stage 2: DFT along dim=-2, ONE (S,2S)@(2S,D) matmul per batch ----
    w2 = w2_ref[...]

    def body(b, carry):
        y = jnp.dot(w2, t_ref[b], preferred_element_type=jnp.float32)  # (S, D)
        o_ref[b] = y.astype(o_ref.dtype)
        return carry

    jax.lax.fori_loop(0, Nb, body, 0, unroll=True)


def _vmem_bytes(nb, S, D, x_bytes, o_bytes, t_bytes, w_bytes,
                acc_bytes=4, target_rows=256):
    """Rough per-grid-step VMEM footprint (pipeline slabs double-buffered)."""
    ssa_rows = min(nb * S, max(S, target_rows))
    return (2 * nb * S * D * x_bytes                     # input slab  (2 bufs)
            + 2 * nb * S * D * o_bytes                   # output slab (2 bufs)
            + 2 * (2 * D * D + 2 * S * S) * w_bytes      # W1 + W2     (2 bufs)
            + nb * 2 * S * D * t_bytes                   # t scratch (single)
            + ssa_rows * 2 * D * acc_bytes)              # live f32 stage-1 chunk


def _pick_batch_block(N, S, D, x_bytes, o_bytes, t_bytes, w_bytes,
                      vmem_budget, m_target):
    """Largest batch block that fills the MXU row dim, keeps >=2 grid steps
    (so both v7x TensorCores get work under 'parallel') and fits VMEM."""
    divisors = [d for d in range(1, N + 1) if N % d == 0]
    fits = [d for d in divisors
            if _vmem_bytes(d, S, D, x_bytes, o_bytes, t_bytes, w_bytes) <= vmem_budget
            and (N // d >= 2 or N == 1)]
    if not fits:
        return 1
    for d in fits:                                # smallest Nb reaching the M target
        if d * S >= m_target:
            return d
    return fits[-1]                               # otherwise: as many rows as allowed


def _pick_chunk_rows(nb, S, D, acc_bytes=4, target_rows=256,
                     max_chunk_bytes=512 * 1024):
    """Stage-1 row-chunk: fill the MXU row dim but bound the live f32 result
    (it is immediately staged into the VMEM scratch)."""
    max_rows = max(8, max_chunk_bytes // (2 * D * acc_bytes))
    rows = min(nb * S, max(target_rows, 8), max_rows)
    if rows >= S:
        bc = max(1, rows // S)
        while nb % bc:
            bc -= 1
        return bc * S
    r = (rows // 8) * 8                           # sublane-aligned divisor of S
    while r > 8 and S % r:
        r -= 8
    return r if (r >= 8 and S % r == 0) else S


def fnet_block(x, *, batch_block=None, compute_dtype=None,
               vmem_budget_bytes=24 << 20, m_target=256):
    """Pallas TPU FNetBlock.forward: Re(fft(fft(x, axis=-1), axis=-2)), x real."""
    orig_shape = x.shape
    out_dtype = x.dtype
    if x.ndim < 2:
        raise ValueError("FNetBlock expects at least 2 dims (..., S, D)")
    x3 = x if x.ndim == 3 else x.reshape((-1,) + x.shape[-2:])
    N, S, D = x3.shape

    if compute_dtype is None:
        compute_dtype = x3.dtype
    compute_dtype = jnp.dtype(compute_dtype)
    x3 = x3.astype(compute_dtype)

    cb = compute_dtype.itemsize
    ob = jnp.dtype(out_dtype).itemsize

    if batch_block is None:
        batch_block = _pick_batch_block(N, S, D, cb, ob, cb, cb,
                                        vmem_budget_bytes, m_target)
    Nb = int(batch_block)
    assert N % Nb == 0, "batch must be divisible by the batch block"
    chunk_rows = _pick_chunk_rows(Nb, S, D)

    # DFT weights, built in f32 for accuracy and cast to the compute dtype.
    cos_d, sin_d = _dft_cos_sin(D)
    cos_s, sin_s = _dft_cos_sin(S)
    w1 = jnp.concatenate([cos_d, sin_d], axis=1).astype(compute_dtype)   # (D, 2D)
    w2 = jnp.concatenate([cos_s, -sin_s], axis=1).astype(compute_dtype)  # (S, 2S)

    vmem_est = _vmem_bytes(Nb, S, D, cb, ob, cb, cb)
    vmem_limit = int(min(max(2 * vmem_est, 32 << 20), 48 << 20))

    kernel = functools.partial(_fnet_kernel, chunk_rows=chunk_rows)
    out = pl.pallas_call(
        kernel,
        out_shape=jax.ShapeDtypeStruct((N, S, D), out_dtype),
        grid_spec=pltpu.PrefetchScalarGridSpec(
            num_scalar_prefetch=0,
            grid=(N // Nb,),
            in_specs=[
                pl.BlockSpec((Nb, S, D), lambda i: (i, 0, 0)),    # x batch slab
                pl.BlockSpec((D, 2 * D), lambda i: (0, 0)),       # [C_D | S_D]
                pl.BlockSpec((S, 2 * S), lambda i: (0, 0)),       # [C_S | -S_S]
            ],
            out_specs=pl.BlockSpec((Nb, S, D), lambda i: (i, 0, 0)),
            scratch_shapes=[pltpu.VMEM((Nb, 2 * S, D), compute_dtype)],
        ),
        compiler_params=pltpu.CompilerParams(
            dimension_semantics=("parallel",),
            vmem_limit_bytes=vmem_limit,
        ),
    )(x3, w1, w2)

    return out.reshape(orig_shape)


if __name__ == "__main__":
    # Small TPU-friendly shapes: batch=16, seq=16, hidden=128 (lane-dense last
    # dim; the heuristic picks Nb=8 -> stage-1 M=128 rows, 2 parallel grid steps).
    N, S, D = 16, 16, 128
    x = jax.random.normal(jax.random.PRNGKey(0), (N, S, D), jnp.float32)

    # Reference: exactly the PyTorch module's math.
    ref = jnp.fft.fft(jnp.fft.fft(x, axis=-1), axis=-2).real

    # f32 path: exact dense DFT, tight tolerance.
    out = jax.block_until_ready(fnet_block(x))
    assert out.shape == ref.shape and out.dtype == ref.dtype
    scale = float(jnp.max(jnp.abs(ref)))
    err = float(jnp.max(jnp.abs(out - ref)))
    assert err <= 5e-3 * scale, f"f32 mismatch: max_err={err}, scale={scale}"

    # bf16-operand path (f32 accumulation) recommended for v6e/v7x MXU throughput.
    out_bf16 = jax.block_until_ready(fnet_block(x, compute_dtype=jnp.bfloat16))
    err_bf16 = float(jnp.max(jnp.abs(out_bf16 - ref)))
    assert err_bf16 <= 2e-2 * scale, f"bf16 mismatch: max_err={err_bf16}, scale={scale}"

    print("KERNEL_OK")
</pallas_src>

<mosaic_0001>
module attributes {stable_mosaic.version = 11 : i64} {
  func.func @_fnet_kernel(%arg0: i32, %arg1: memref<8x16x128xf32, #tpu.memory_space<vmem>>, %arg2: memref<128x256xf32, #tpu.memory_space<vmem>>, %arg3: memref<16x32xf32, #tpu.memory_space<vmem>>, %arg4: memref<8x16x128xf32, #tpu.memory_space<vmem>>, %arg5: memref<8x32x128xf32, #tpu.memory_space<vmem>>) attributes {dimension_semantics = [#tpu.dimension_semantics<parallel>], iteration_bounds = array<i64: 2>, scalar_prefetch = 0 : i64, scratch_operands = 1 : i64, tpu.core_type = #tpu.core_type<tc>, window_params = [{transform_indices = @transform_0, window_bounds = array<i64: 8, 16, 128>}, {pipeline_mode = #tpu.pipeline_mode<synchronous>, transform_indices = @transform_1, window_bounds = array<i64: 128, 256>}, {pipeline_mode = #tpu.pipeline_mode<synchronous>, transform_indices = @transform_2, window_bounds = array<i64: 16, 32>}, {transform_indices = @transform_3, window_bounds = array<i64: 8, 16, 128>}]} {
    %c0 = arith.constant 0 : index
    %c0_0 = arith.constant 0 : index
    %0 = vector.load %arg2[%c0, %c0_0] : memref<128x256xf32, #tpu.memory_space<vmem>>, vector<128x256xf32>
    %c0_1 = arith.constant 0 : index
    %c0_2 = arith.constant 0 : index
    %c0_3 = arith.constant 0 : index
    %1 = vector.load %arg1[%c0_1, %c0_2, %c0_3] : memref<8x16x128xf32, #tpu.memory_space<vmem>>, vector<8x16x128xf32>
    %2 = vector.shape_cast %1 : vector<8x16x128xf32> to vector<128x128xf32>
    %cst = arith.constant dense<0.000000e+00> : vector<128x256xf32>
    %3 = tpu.matmul %2, %0, %cst {dimension_numbers = #tpu.dot_dimension_numbers<[1], [0], [0], [1], [0, 0, 1, 1], [], []>} : vector<128x128xf32>, vector<128x256xf32>, vector<128x256xf32> -> vector<128x256xf32>
    %4 = vector.extract_strided_slice %3 {offsets = [0, 0], sizes = [128, 128], strides = [1, 1]} : vector<128x256xf32> to vector<128x128xf32>
    %5 = vector.shape_cast %4 : vector<128x128xf32> to vector<8x16x128xf32>
    %c0_4 = arith.constant 0 : index
    %c0_5 = arith.constant 0 : index
    %c0_6 = arith.constant 0 : index
    %6 = vector.load %arg5[%c0_4, %c0_5, %c0_6] : memref<8x32x128xf32, #tpu.memory_space<vmem>>, vector<8x16x128xf32>
    tpu.vector_store %arg5[%c0_4, %c0_5, %c0_6], %5 {strides = array<i32>} : memref<8x32x128xf32, #tpu.memory_space<vmem>>, vector<8x16x128xf32>,
    %7 = vector.extract_strided_slice %3 {offsets = [0, 128], sizes = [128, 128], strides = [1, 1]} : vector<128x256xf32> to vector<128x128xf32>
    %8 = vector.shape_cast %7 : vector<128x128xf32> to vector<8x16x128xf32>
    %c0_7 = arith.constant 0 : index
    %c16 = arith.constant 16 : index
    %c0_8 = arith.constant 0 : index
    %9 = vector.load %arg5[%c0_7, %c16, %c0_8] : memref<8x32x128xf32, #tpu.memory_space<vmem>>, vector<8x16x128xf32>
    tpu.vector_store %arg5[%c0_7, %c16, %c0_8], %8 {strides = array<i32>} : memref<8x32x128xf32, #tpu.memory_space<vmem>>, vector<8x16x128xf32>,
    %c0_9 = arith.constant 0 : index
    %c0_10 = arith.constant 0 : index
    %10 = vector.load %arg3[%c0_9, %c0_10] : memref<16x32xf32, #tpu.memory_space<vmem>>, vector<16x32xf32>
    %c0_i32 = arith.constant 0 : i32
    %11 = arith.index_cast %c0_i32 : i32 to index
    %c0_11 = arith.constant 0 : index
    %c0_12 = arith.constant 0 : index
    %12 = vector.load %arg5[%11, %c0_11, %c0_12] : memref<8x32x128xf32, #tpu.memory_space<vmem>>, vector<1x32x128xf32>
    %13 = vector.shape_cast %12 : vector<1x32x128xf32> to vector<32x128xf32>
    %cst_13 = arith.constant dense<0.000000e+00> : vector<16x128xf32>
    %14 = tpu.matmul %10, %13, %cst_13 {dimension_numbers = #tpu.dot_dimension_numbers<[1], [0], [0], [1], [0, 0, 1, 1], [], []>} : vector<16x32xf32>, vector<32x128xf32>, vector<16x128xf32> -> vector<16x128xf32>
    %15 = arith.index_cast %c0_i32 : i32 to index
    %c0_14 = arith.constant 0 : index
    %c0_15 = arith.constant 0 : index
    %16 = vector.load %arg4[%15, %c0_14, %c0_15] : memref<8x16x128xf32, #tpu.memory_space<vmem>>, vector<1x16x128xf32>
    %17 = vector.shape_cast %16 : vector<1x16x128xf32> to vector<16x128xf32>
    %18 = vector.shape_cast %14 : vector<16x128xf32> to vector<1x16x128xf32>
    tpu.vector_store %arg4[%15, %c0_14, %c0_15], %18 {strides = array<i32>} : memref<8x16x128xf32, #tpu.memory_space<vmem>>, vector<1x16x128xf32>,
    %c1_i32 = arith.constant 1 : i32
    %19 = arith.index_cast %c1_i32 : i32 to index
    %c0_16 = arith.constant 0 : index
    %c0_17 = arith.constant 0 : index
    %20 = vector.load %arg5[%19, %c0_16, %c0_17] : memref<8x32x128xf32, #tpu.memory_space<vmem>>, vector<1x32x128xf32>
    %21 = vector.shape_cast %20 : vector<1x32x128xf32> to vector<32x128xf32>
    %cst_18 = arith.constant dense<0.000000e+00> : vector<16x128xf32>
    %22 = tpu.matmul %10, %21, %cst_18 {dimension_numbers = #tpu.dot_dimension_numbers<[1], [0], [0], [1], [0, 0, 1, 1], [], []>} : vector<16x32xf32>, vector<32x128xf32>, vector<16x128xf32> -> vector<16x128xf32>
    %23 = arith.index_cast %c1_i32 : i32 to index
    %c0_19 = arith.constant 0 : index
    %c0_20 = arith.constant 0 : index
    %24 = vector.load %arg4[%23, %c0_19, %c0_20] : memref<8x16x128xf32, #tpu.memory_space<vmem>>, vector<1x16x128xf32>
    %25 = vector.shape_cast %24 : vector<1x16x128xf32> to vector<16x128xf32>
    %26 = vector.shape_cast %22 : vector<16x128xf32> to vector<1x16x128xf32>
    tpu.vector_store %arg4[%23, %c0_19, %c0_20], %26 {strides = array<i32>} : memref<8x16x128xf32, #tpu.memory_space<vmem>>, vector<1x16x128xf32>,
    %c2_i32 = arith.constant 2 : i32
    %27 = arith.index_cast %c2_i32 : i32 to index
    %c0_21 = arith.constant 0 : index
    %c0_22 = arith.constant 0 : index
    %28 = vector.load %arg5[%27, %c0_21, %c0_22] : memref<8x32x128xf32, #tpu.memory_space<vmem>>, vector<1x32x128xf32>
    %29 = vector.shape_cast %28 : vector<1x32x128xf32> to vector<32x128xf32>
    %cst_23 = arith.constant dense<0.000000e+00> : vector<16x128xf32>
    %30 = tpu.matmul %10, %29, %cst_23 {dimension_numbers = #tpu.dot_dimension_numbers<[1], [0], [0], [1], [0, 0, 1, 1], [], []>} : vector<16x32xf32>, vector<32x128xf32>, vector<16x128xf32> -> vector<16x128xf32>
    %31 = arith.index_cast %c2_i32 : i32 to index
    %c0_24 = arith.constant 0 : index
    %c0_25 = arith.constant 0 : index
    %32 = vector.load %arg4[%31, %c0_24, %c0_25] : memref<8x16x128xf32, #tpu.memory_space<vmem>>, vector<1x16x128xf32>
    %33 = vector.shape_cast %32 : vector<1x16x128xf32> to vector<16x128xf32>
    %34 = vector.shape_cast %30 : vector<16x128xf32> to vector<1x16x128xf32>
    tpu.vector_store %arg4[%31, %c0_24, %c0_25], %34 {strides = array<i32>} : memref<8x16x128xf32, #tpu.memory_space<vmem>>, vector<1x16x128xf32>,
    %c3_i32 = arith.constant 3 : i32
    %35 = arith.index_cast %c3_i32 : i32 to index
    %c0_26 = arith.constant 0 : index
    %c0_27 = arith.constant 0 : index
    %36 = vector.load %arg5[%35, %c0_26, %c0_27] : memref<8x32x128xf32, #tpu.memory_space<vmem>>, vector<1x32x128xf32>
    %37 = vector.shape_cast %36 : vector<1x32x128xf32> to vector<32x128xf32>
    %cst_28 = arith.constant dense<0.000000e+00> : vector<16x128xf32>
    %38 = tpu.matmul %10, %37, %cst_28 {dimension_numbers = #tpu.dot_dimension_numbers<[1], [0], [0], [1], [0, 0, 1, 1], [], []>} : vector<16x32xf32>, vector<32x128xf32>, vector<16x128xf32> -> vector<16x128xf32>
    %39 = arith.index_cast %c3_i32 : i32 to index
    %c0_29 = arith.constant 0 : index
    %c0_30 = arith.constant 0 : index
    %40 = vector.load %arg4[%39, %c0_29, %c0_30] : memref<8x16x128xf32, #tpu.memory_space<vmem>>, vector<1x16x128xf32>
    %41 = vector.shape_cast %40 : vector<1x16x128xf32> to vector<16x128xf32>
    %42 = vector.shape_cast %38 : vector<16x128xf32> to vector<1x16x128xf32>
    tpu.vector_store %arg4[%39, %c0_29, %c0_30], %42 {strides = array<i32>} : memref<8x16x128xf32, #tpu.memory_space<vmem>>, vector<1x16x128xf32>,
    %c4_i32 = arith.constant 4 : i32
    %43 = arith.index_cast %c4_i32 : i32 to index
    %c0_31 = arith.constant 0 : index
    %c0_32 = arith.constant 0 : index
    %44 = vector.load %arg5[%43, %c0_31, %c0_32] : memref<8x32x128xf32, #tpu.memory_space<vmem>>, vector<1x32x128xf32>
    %45 = vector.shape_cast %44 : vector<1x32x128xf32> to vector<32x128xf32>
    %cst_33 = arith.constant dense<0.000000e+00> : vector<16x128xf32>
    %46 = tpu.matmul %10, %45, %cst_33 {dimension_numbers = #tpu.dot_dimension_numbers<[1], [0], [0], [1], [0, 0, 1, 1], [], []>} : vector<16x32xf32>, vector<32x128xf32>, vector<16x128xf32> -> vector<16x128xf32>
    %47 = arith.index_cast %c4_i32 : i32 to index
    %c0_34 = arith.constant 0 : index
    %c0_35 = arith.constant 0 : index
    %48 = vector.load %arg4[%47, %c0_34, %c0_35] : memref<8x16x128xf32, #tpu.memory_space<vmem>>, vector<1x16x128xf32>
    %49 = vector.shape_cast %48 : vector<1x16x128xf32> to vector<16x128xf32>
    %50 = vector.shape_cast %46 : vector<16x128xf32> to vector<1x16x128xf32>
    tpu.vector_store %arg4[%47, %c0_34, %c0_35], %50 {strides = array<i32>} : memref<8x16x128xf32, #tpu.memory_space<vmem>>, vector<1x16x128xf32>,
    %c5_i32 = arith.constant 5 : i32
    %51 = arith.index_cast %c5_i32 : i32 to index
    %c0_36 = arith.constant 0 : index
    %c0_37 = arith.constant 0 : index
    %52 = vector.load %arg5[%51, %c0_36, %c0_37] : memref<8x32x128xf32, #tpu.memory_space<vmem>>, vector<1x32x128xf32>
    %53 = vector.shape_cast %52 : vector<1x32x128xf32> to vector<32x128xf32>
    %cst_38 = arith.constant dense<0.000000e+00> : vector<16x128xf32>
    %54 = tpu.matmul %10, %53, %cst_38 {dimension_numbers = #tpu.dot_dimension_numbers<[1], [0], [0], [1], [0, 0, 1, 1], [], []>} : vector<16x32xf32>, vector<32x128xf32>, vector<16x128xf32> -> vector<16x128xf32>
    %55 = arith.index_cast %c5_i32 : i32 to index
    %c0_39 = arith.constant 0 : index
    %c0_40 = arith.constant 0 : index
    %56 = vector.load %arg4[%55, %c0_39, %c0_40] : memref<8x16x128xf32, #tpu.memory_space<vmem>>, vector<1x16x128xf32>
    %57 = vector.shape_cast %56 : vector<1x16x128xf32> to vector<16x128xf32>
    %58 = vector.shape_cast %54 : vector<16x128xf32> to vector<1x16x128xf32>
    tpu.vector_store %arg4[%55, %c0_39, %c0_40], %58 {strides = array<i32>} : memref<8x16x128xf32, #tpu.memory_space<vmem>>, vector<1x16x128xf32>,
    %c6_i32 = arith.constant 6 : i32
    %59 = arith.index_cast %c6_i32 : i32 to index
    %c0_41 = arith.constant 0 : index
    %c0_42 = arith.constant 0 : index
    %60 = vector.load %arg5[%59, %c0_41, %c0_42] : memref<8x32x128xf32, #tpu.memory_space<vmem>>, vector<1x32x128xf32>
    %61 = vector.shape_cast %60 : vector<1x32x128xf32> to vector<32x128xf32>
    %cst_43 = arith.constant dense<0.000000e+00> : vector<16x128xf32>
    %62 = tpu.matmul %10, %61, %cst_43 {dimension_numbers = #tpu.dot_dimension_numbers<[1], [0], [0], [1], [0, 0, 1, 1], [], []>} : vector<16x32xf32>, vector<32x128xf32>, vector<16x128xf32> -> vector<16x128xf32>
    %63 = arith.index_cast %c6_i32 : i32 to index
    %c0_44 = arith.constant 0 : index
    %c0_45 = arith.constant 0 : index
    %64 = vector.load %arg4[%63, %c0_44, %c0_45] : memref<8x16x128xf32, #tpu.memory_space<vmem>>, vector<1x16x128xf32>
    %65 = vector.shape_cast %64 : vector<1x16x128xf32> to vector<16x128xf32>
    %66 = vector.shape_cast %62 : vector<16x128xf32> to vector<1x16x128xf32>
    tpu.vector_store %arg4[%63, %c0_44, %c0_45], %66 {strides = array<i32>} : memref<8x16x128xf32, #tpu.memory_space<vmem>>, vector<1x16x128xf32>,
    %c7_i32 = arith.constant 7 : i32
    %67 = arith.index_cast %c7_i32 : i32 to index
    %c0_46 = arith.constant 0 : index
    %c0_47 = arith.constant 0 : index
    %68 = vector.load %arg5[%67, %c0_46, %c0_47] : memref<8x32x128xf32, #tpu.memory_space<vmem>>, vector<1x32x128xf32>
    %69 = vector.shape_cast %68 : vector<1x32x128xf32> to vector<32x128xf32>
    %cst_48 = arith.constant dense<0.000000e+00> : vector<16x128xf32>
    %70 = tpu.matmul %10, %69, %cst_48 {dimension_numbers = #tpu.dot_dimension_numbers<[1], [0], [0], [1], [0, 0, 1, 1], [], []>} : vector<16x32xf32>, vector<32x128xf32>, vector<16x128xf32> -> vector<16x128xf32>
    %71 = arith.index_cast %c7_i32 : i32 to index
    %c0_49 = arith.constant 0 : index
    %c0_50 = arith.constant 0 : index
    %72 = vector.load %arg4[%71, %c0_49, %c0_50] : memref<8x16x128xf32, #tpu.memory_space<vmem>>, vector<1x16x128xf32>
    %73 = vector.shape_cast %72 : vector<1x16x128xf32> to vector<16x128xf32>
    %74 = vector.shape_cast %70 : vector<16x128xf32> to vector<1x16x128xf32>
    tpu.vector_store %arg4[%71, %c0_49, %c0_50], %74 {strides = array<i32>} : memref<8x16x128xf32, #tpu.memory_space<vmem>>, vector<1x16x128xf32>,
    %c8_i32 = arith.constant 8 : i32
    return
  }
  func.func @transform_0(%arg0: i32) -> (i32, i32, i32) {
    %c0_i32 = arith.constant 0 : i32
    %c0_i32_0 = arith.constant 0 : i32
    %c0_i32_1 = arith.constant 0 : i32
    return %arg0, %c0_i32, %c0_i32_0 : i32, i32, i32
  }
  func.func @transform_1(%arg0: i32) -> (i32, i32) {
    %c0_i32 = arith.constant 0 : i32
    %c0_i32_0 = arith.constant 0 : i32
    %c0_i32_1 = arith.constant 0 : i32
    return %c0_i32, %c0_i32_0 : i32, i32
  }
  func.func @transform_2(%arg0: i32) -> (i32, i32) {
    %c0_i32 = arith.constant 0 : i32
    %c0_i32_0 = arith.constant 0 : i32
    %c0_i32_1 = arith.constant 0 : i32
    return %c0_i32, %c0_i32_0 : i32, i32
  }
  func.func @transform_3(%arg0: i32) -> (i32, i32, i32) {
    %c0_i32 = arith.constant 0 : i32
    %c0_i32_0 = arith.constant 0 : i32
    %c0_i32_1 = arith.constant 0 : i32
    return %arg0, %c0_i32, %c0_i32_0 : i32, i32, i32
  }
}

</mosaic_0001>

<bundles_post_ra>
// kernel: tpu_custom_call.1
= control target key start
LH: loop header
LB: loop body
LE: loop exit
PB: predicated region body
PF: predicated region fallthrough
CT: control target
= control target key end

     0   :  { %8 = vsyncpa [#allocation4], 0  ;;  %s2122_s0 = inlined_call_operand.hbm [shape: f32[16,16,128], index: 0, kind: input, shape index: {}]   ;;  %s2123_s1 = inlined_call_operand.hbm [shape: f32[128,256], index: 1, kind: input, shape index: {}]   ;;  %s2124_s2 = inlined_call_operand.hbm [shape: f32[16,32], index: 2, kind: input, shape index: {}]   ;;  %s2125_s3 = inlined_call_operand.hbm [shape: f32[16,16,128], index: 3, kind: output, shape index: {}]  }
   0x1   :  { %10 = vsyncpa [#allocation4 + $0x1], 0 }
   0x2   :  { %11 = vsyncpa [#allocation7], 0 }
   0x3   :  { %12 = vsyncpa [#allocation5], 0 }
   0x4   :  { %14 = vsyncpa [#allocation5 + $0x1], 0  ;;  %s1789_s12 = smov 0   ;;  %s1791_s13 = smov 0  }
   0x5   :  { %s1793_s14 = smov 0   ;;  %s1795_s15 = smov 0  }
   0x6 LB: > { %s1810_s16 = sadd.s32 4294967295, %s1756_s15   ;;  %s1240_s17 = sadd.s32 4294967294, %s1756_s15   ;;  %s1756_s15 = sphi %s1795_s15, %s2145_s15   ;;  %s1752_s14 = sphi %s1793_s14, %s2144_s14   ;;  %s1748_s13 = sphi %s1791_s13, %s2143_s13   ;;  %s1744_s12 = sphi %s1789_s12, %s2142_s12  }
   0x7   : > { %p40_p0 = scmp.ne.s32.totalorder %s1748_s13, %s1744_s12  ;;  %p2126_p1 = scmp.eq.s32.totalorder %s1810_s16, 0 }
   0x8   : > { %p112_p3 = scmp.eq.s32.totalorder %s1240_s17, 1  ;;  %p1241_p5 = scmp.ge.s32.totalorder %s1756_s15, 1 }
   0x9   : > { %p1819_p4 = por %p2126_p1, %p40_p0  ;;  %p119_p7 = scmp.lt.s32.totalorder %s1756_s15, 3 }
   0xa   : > { %p1824_p6 = por %p112_p3, %p40_p0  ;;  %s1758_s21 = smov [#allocation6]  }
   0xb   : > { %s2129_s18 = scalar_select %p1819_p4, 1, 0 }
   0xc   : > { %s2130_s19 = scalar_select %p1824_p6, 1, 0 }
   0xd   : > { %p1829_p8 = pnand %p1241_p5, %p119_p7  ;;  %s131_s22 = sshll.u32 %s1758_s21, 4  ;;  %s1833_s22 = int_to_ptr.vmem [resolvable:$true] %s131_s22 }
   0xe   : > { %s1759_s24 = smov [#allocation8]   ;;  %s1600_s28 = scalar_lea.hbm %s2123_s1, 4096 }
   0xf   : > { %p1538_p9 = pneg %p1829_p8  ;;  %s144_s25 = sshll.u32 %s1759_s24, 4  ;;  %s1844_s25 = int_to_ptr.vmem [resolvable:$true] %s144_s25 }
  0x10   : > { %p1601_p12 = scmp.ne.s32.totalorder %s2123_s1, %s1600_s28  ;;  %p1607_p5 = scmp.lt.u32.totalorder %s1600_s28, %s2123_s1 }
  0x11   : > { %p1840_p11 = pnand %p1538_p9, %p2126_p1 }
  0x13   : > { %p1602_p13 = pneg %p1840_p11 }
  0x15   : > { %p1603_p0 = pnand %p1602_p13, %p1601_p12 }
  0x17   : > { %p1604_p3 = pneg %p1603_p0 }
  0x19   : > { %p1609_p7 = pnand %p1607_p5, %p1604_p3 }
  0x1b   : > { %1612 = shalt.err (!%p1609_p7)
}
  0x1c   : > { %s1613_s6 = scalar_lea.vmem %s1833_s22, 4096  ;;  %p1621_p2 = scmp.lt.s32.totalorder %s1833_s22, %s1833_s22 }
  0x1d   : > { %p1614_p9 = scmp.ne.s32.totalorder %s1833_s22, %s1613_s6  ;;  %p1622_p12 = scmp.lt.s32.totalorder %s1613_s6, %s1613_s6 }
  0x1f   : > { %p1616_p10 = pnand %p1614_p9, %p1602_p13  ;;  %p1623_p0 = por %p1622_p12, %p1621_p2 }
  0x21   : > { %p1617_p1 = pneg %p1616_p10 }
  0x23   : > { %p1624_p6 = pnand %p1623_p0, %p1617_p1 }
  0x25   : > { %1627 = shalt.err (!%p1624_p6)
}
  0x26   : > { %s1760_s7 = smov 256   ;;  %s1761_s8 = smov 16  }
  0x27   : > { %1541 = dma.hbm_to_vmem [thread:$0]  (!%p1840_p11), %s2123_s1, 4096, %s1833_s22, [#allocation7], %s1760_s7, %s1760_s7, %s1761_s8  }
  0x28   : > { %s1628_s21 = scalar_lea.hbm %s2124_s2, 256 }
  0x29   : > { %p1629_p2 = scmp.ne.s32.totalorder %s2124_s2, %s1628_s21  ;;  %p1635_p10 = scmp.lt.u32.totalorder %s1628_s21, %s2124_s2 }
  0x2b   : > { %p1631_p1 = pnand %p1629_p2, %p1602_p13 }
  0x2d   : > { %p1632_p6 = pneg %p1631_p1 }
  0x2f   : > { %p1637_p3 = pnand %p1635_p10, %p1632_p6 }
  0x31   : > { %1640 = shalt.err (!%p1637_p3)
}
  0x32   : > { %s1641_s22 = scalar_lea.vmem %s1844_s25, 256  ;;  %p1649_p12 = scmp.lt.s32.totalorder %s1844_s25, %s1844_s25 }
  0x33   : > { %p1642_p5 = scmp.ne.s32.totalorder %s1844_s25, %s1641_s22  ;;  %p1650_p0 = scmp.lt.s32.totalorder %s1641_s22, %s1641_s22 }
  0x35   : > { %p1644_p7 = pnand %p1642_p5, %p1602_p13  ;;  %p1651_p2 = por %p1650_p0, %p1649_p12 }
  0x37   : > { %p1645_p9 = pneg %p1644_p7 }
  0x39   : > { %p1652_p1 = pnand %p1651_p2, %p1645_p9 }
  0x3b   : > { %1655 = shalt.err (!%p1652_p1)
}
  0x3c   : > { %s1762_s29 = smov 128   ;;  %s1763_s30 = smov 8  }
  0x3d   : > { %1544 = dma.hbm_to_vmem [thread:$0]  (!%p1840_p11), %s2124_s2, 256, %s1844_s25, [#allocation7], %s1762_s29, %s1762_s29, %s1763_s30  }
  0x3e   : > { %s1902_s6 = sadd.s32 1, %s1756_s15   ;;  %s27_s8 = sadd.s32 1, %s1752_s14 }
  0x3f   : > { %s24_s7 = ssub.s32 %s1756_s15, %s1902_s6  ;;  %p34_p6 = scmp.ne.s32.totalorder %s1752_s14, %s1748_s13 }
  0x40   : > { %p25_p13 = scmp.eq.s32.totalorder %s24_s7, 0  ;;  %p35_p10 = scmp.eq.s32.totalorder %s1756_s15, 0 }
  0x41   : > { %p2133_p5 = scmp.eq.s32.totalorder %s1810_s16, 1  ;;  %p1555_p9 = scmp.lt.s32.totalorder %s1756_s15, 2 }
  0x42   : > { %s1911_s9 = scalar_select %p25_p13, %s1752_s14, %s27_s8  }
  0x43   : > { %p36_p3 = por %p35_p10, %p34_p6  ;;  %p1915_p7 = por %p2133_p5, %p34_p6 }
  0x44   : > { %s158_s10 = sand.u32 1, %s1752_s14   ;;  %s1291_s25 = sshll.u32 %s1756_s15, 11 }
  0x45   : > { %s2134_s23 = scalar_select %p1915_p7, 1, 0 }
  0x46   : > { %s1245_s11 = sshll.u32 %s158_s10, 7  ;;  %s1925_s24 = scalar_lea.hbm %s2122_s0, %s1291_s25 }
  0x47   : > { %s162_s26 = scalar_lea.vmem [#allocation3], %s1245_s11  ;;  %p1929_p11 = pnand %p1555_p9, %p36_p3 }
  0x48   : > { %s170_s27 = sshll.u32 %s162_s26, 4  ;;  %s1933_s22 = scalar_lea.sflag [#allocation4], %s158_s10  ;;  %s1927_s27 = int_to_ptr.vmem [resolvable:$true] %s170_s27 }
  0x49   : > { %s1656_s4 = scalar_lea.hbm %s1925_s24, 2048  ;;  %p1658_p0 = pneg %p1929_p11 }
  0x4a   : > { %p1657_p12 = scmp.ne.s32.totalorder %s1925_s24, %s1656_s4  ;;  %s1661_s8 = scalar_lea.hbm %s2122_s0, 4096 }
  0x4b   : > { %p1662_p13 = scmp.lt.u32.totalorder %s1925_s24, %s2122_s0  ;;  %p1663_p6 = scmp.lt.u32.totalorder %s1661_s8, %s1656_s4 }
  0x4c   : > { %p1659_p2 = pnand %p1658_p0, %p1657_p12  ;;  %p1665_p3 = scmp.lt.u32.totalorder %s1656_s4, %s1925_s24 }
  0x4d   : > { %p1664_p10 = por %p1663_p6, %p1662_p13 }
  0x4e   : > { %p1660_p1 = pneg %p1659_p2 }
  0x4f   : > { %p1666_p5 = por %p1665_p3, %p1664_p10 }
  0x51   : > { %p1667_p9 = pnand %p1666_p5, %p1660_p1 }
  0x53   : > { %1670 = shalt.err (!%p1667_p9)
}
  0x54   : > { %s1671_s10 = scalar_lea.vmem %s1927_s27, 2048  ;;  %s1764_s17 = smov [#allocation3]  }
  0x55   : > { %p1672_p12 = scmp.ne.s32.totalorder %s1927_s27, %s1671_s10  ;;  %s1676_s21 = sshll.u32 %s1764_s17, 4  ;;  %s1677_s21 = int_to_ptr.vmem [resolvable:$false] %s1676_s21 }
  0x56   : > { %s1678_s26 = scalar_lea.vmem %s1677_s21, 4096  ;;  %p1679_p4 = scmp.lt.s32.totalorder %s1927_s27, %s1677_s21 }
  0x57   : > { %p1674_p2 = pnand %p1672_p12, %p1658_p0  ;;  %p1680_p13 = scmp.lt.s32.totalorder %s1678_s26, %s1671_s10 }
  0x59   : > { %p1675_p7 = pneg %p1674_p2  ;;  %p1681_p6 = por %p1680_p13, %p1679_p4 }
  0x5b   : > { %p1682_p10 = pnand %p1681_p6, %p1675_p7 }
  0x5d   : > { %1685 = shalt.err (!%p1682_p10)
}
  0x5e   : > { %1548 = dma.hbm_to_vmem [thread:$0]  (!%p1929_p11), %s1925_s24, 2048, %s1927_s27, %s1933_s22, %s1762_s29, %s1762_s29, %s1763_s30  }
  0x5f   : > { %182 = sbr.rel (%p1829_p8) target bundleno = 651 (0x28b), region = 32  ;;  %s1967_s4 = sand.u32 (!%p1829_p8), 1, %s1748_s13  }
  0x60   : > { %s1250_s5 = sshll.u32 (!%p1829_p8), %s1967_s4, 7  ;;  %s185_s7 = scalar_lea.sflag (!%p1829_p8), [#allocation4], %s1967_s4 }
  0x61   : > { %s1973_s28 = scalar_lea.vmem (!%p1829_p8), [#allocation3], %s1250_s5  ;;  %p2136_p4 = scmp.ne.s32.totalorder (!%p1829_p8), %s2129_s18, 0 }
  0x66   : > { %1731 = dma.done.wait (%p2136_p4), %s185_s7, 2048  }
  0x67   : > { %1733 = vsyncadd (%p2136_p4), %s185_s7, 4294965248  ;;  %p2137_p7 = scmp.eq.s32.totalorder %s1810_s16, 0 }
  0x69   : > { %1735 = dma.done.wait (%p2137_p7), [#allocation7], 4352   ;;  %p2138_p8 = pmov %p2137_p7 }
  0x6a   : > { %v1765_v0 = vmov 0.0   ;;  %v222_v1 = vld [vmem:[#allocation6 + $0x8] sm:$0xff]  ;;  %v224_v2 = vld [vmem:[#allocation6 + $0x18] sm:$0xff]  ;;  %v221_v3 = vld [vmem:[#allocation6] sm:$0xff]  ;;  %vm468_vm0 = vcmask 261120   ;;  %s2053_s18 = scalar_lea.vmem [#allocation9], %s1250_s5 }
  0x6b   : > { %1737 = vsyncadd (%p2138_p8), [#allocation7], 4294962944  ;;  %333 = vmatprep.mubr.f32.mxu0 %v1765_v0  ;;  %v1430_v4 = vpack.c.bf16 %v224_v2, %v222_v1  ;;  %v223_v5 = vld [vmem:[#allocation6 + $0x10] sm:$0xff]  ;;  %v226_v6 = vld [vmem:[#allocation6 + $0x28] sm:$0xff]  ;;  %s1293_s20 = sshll.u32 %s1810_s16, 11  ;;  %s1148_s29 = sshll.u32 %s2053_s18, 4  ;;  %s2076_s29 = int_to_ptr.vmem [resolvable:$true] %s1148_s29 }
  0x6c   : > { %v228_v7 = vld [vmem:[#allocation6 + $0x38] sm:$0xff]  ;;  %v1432_v8 = vpack.c.bf16 %v223_v5, %v221_v3  ;;  %v225_v10 = vld [vmem:[#allocation6 + $0x20] sm:$0xff]  ;;  %v227_v11 = vld [vmem:[#allocation6 + $0x30] sm:$0xff]  ;;  %s2074_s27 = scalar_lea.hbm %s2125_s3, %s1293_s20  ;;  %s1134_s22 = scalar_lea.sflag [#allocation5], %s1967_s4 }
  0x6d   : > { %v1434_v9 = vpack.c.bf16 %v228_v7, %v226_v6  ;;  %v230_v12 = vld [vmem:[#allocation6 + $0x48] sm:$0xff]  ;;  %1431 = vmatprep.subr.bf16.mxu0 %v1430_v4  ;;  %v232_v13 = vld [vmem:[#allocation6 + $0x58] sm:$0xff]  ;;  %v1436_v14 = vpack.c.bf16 %v227_v11, %v225_v10  ;;  %v229_v16 = vld [vmem:[#allocation6 + $0x40] sm:$0xff]  ;;  %s1686_s8 = scalar_lea.vmem %s2076_s29, 2048  ;;  %p2139_p0 = scmp.ne.s32.totalorder %s2134_s23, 0 }
  0x6e   : > { %1433 = vmatpush1.bf16.msra.mxu0 %v1432_v8  ;;  %v1438_v15 = vpack.c.bf16 %v232_v13, %v230_v12  ;;  %v231_v17 = vld [vmem:[#allocation6 + $0x50] sm:$0xff]  ;;  %v234_v18 = vld [vmem:[#allocation6 + $0x68] sm:$0xff]  ;;  %v236_v19 = vld [vmem:[#allocation6 + $0x78] sm:$0xff]  ;;  %p1687_p11 = scmp.ne.s32.totalorder %s2076_s29, %s1686_s8  ;;  %s1766_s16 = smov [#allocation9]  }
  0x6f   : > { %1435 = vmatprep.subr.bf16.mxu0 %v1434_v9  ;;  %v1440_v20 = vpack.c.bf16 %v231_v17, %v229_v16  ;;  %v1442_v21 = vpack.c.bf16 %v236_v19, %v234_v18  ;;  %v233_v22 = vld [vmem:[#allocation6 + $0x60] sm:$0xff]  ;;  %v235_v23 = vld [vmem:[#allocation6 + $0x70] sm:$0xff]  ;;  %v238_v24 = vld [vmem:[#allocation6 + $0x88] sm:$0xff]  ;;  %s1690_s11 = sshll.u32 %s1766_s16, 4  ;;  %s1691_s11 = int_to_ptr.vmem [resolvable:$false] %s1690_s11 }
  0x70   : > { %v240_v25 = vld [vmem:[#allocation6 + $0x98] sm:$0xff]  ;;  %v1444_v26 = vpack.c.bf16 %v235_v23, %v233_v22  ;;  %v237_v28 = vld [vmem:[#allocation6 + $0x80] sm:$0xff]  ;;  %v239_v29 = vld [vmem:[#allocation6 + $0x90] sm:$0xff]  ;;  %p1688_p1 = pnand %p1687_p11, %p2139_p0  ;;  %s1692_s25 = scalar_lea.vmem %s1691_s11, 4096 }
  0x71   : > { %v1446_v27 = vpack.c.bf16 %v240_v25, %v238_v24  ;;  %v242_v30 = vld [vmem:[#allocation6 + $0xa8] sm:$0xff]  ;;  %v244_v31 = vld [vmem:[#allocation6 + $0xb8] sm:$0xff]  ;;  %v1448_v32 = vpack.c.bf16 %v239_v29, %v237_v28  ;;  %v241_v34 = vld [vmem:[#allocation6 + $0xa0] sm:$0xff]  ;;  %p1693_p5 = scmp.lt.s32.totalorder %s2076_s29, %s1691_s11  ;;  %p1694_p9 = scmp.lt.s32.totalorder %s1692_s25, %s1686_s8 }
  0x72   : > { %1437 = vmatpush1.bf16.msra.mxu0 %v1436_v14  ;;  %v1450_v33 = vpack.c.bf16 %v244_v31, %v242_v30  ;;  %v243_v35 = vld [vmem:[#allocation6 + $0xb0] sm:$0xff]  ;;  %v246_v36 = vld [vmem:[#allocation6 + $0xc8] sm:$0xff]  ;;  %v248_v37 = vld [vmem:[#allocation6 + $0xd8] sm:$0xff]  ;;  %p1689_p3 = pneg %p1688_p1 }
  0x73   : > { %1439 = vmatprep.subr.bf16.mxu0 %v1438_v15  ;;  %v1452_v38 = vpack.c.bf16 %v243_v35, %v241_v34  ;;  %v1454_v39 = vpack.c.bf16 %v248_v37, %v246_v36  ;;  %v245_v40 = vld [vmem:[#allocation6 + $0xc0] sm:$0xff]  ;;  %v247_v41 = vld [vmem:[#allocation6 + $0xd0] sm:$0xff]  ;;  %v250_v42 = vld [vmem:[#allocation6 + $0xe8] sm:$0xff]  ;;  %p1695_p12 = por %p1694_p9, %p1693_p5 }
  0x74   : > { %v252_v43 = vld [vmem:[#allocation6 + $0xf8] sm:$0xff]  ;;  %v1456_v44 = vpack.c.bf16 %v247_v41, %v245_v40  ;;  %v249_v46 = vld [vmem:[#allocation6 + $0xe0] sm:$0xff]  ;;  %v251_v47 = vld [vmem:[#allocation6 + $0xf0] sm:$0xff] }
  0x75   : > { %v1458_v45 = vpack.c.bf16 %v252_v43, %v250_v42  ;;  %v1460_v48 = vpack.c.bf16 %v251_v47, %v249_v46  ;;  %v253_v49 = vld [vmem:[%s1973_s28] sm:$0xff]  ;;  %v254_v50 = vld [vmem:[%s1973_s28 + $0x8] sm:$0xff]  ;;  %v255_v51 = vld [vmem:[%s1973_s28 + $0x10] sm:$0xff]  ;;  %p1696_p2 = pnand %p1695_p12, %p1689_p3 }
  0x76   : > { %1441 = vmatpush1.bf16.msra.mxu0 %v1440_v20  ;;  %v256_v52 = vld [vmem:[%s1973_s28 + $0x18] sm:$0xff]  ;;  %v257_v53 = vld [vmem:[%s1973_s28 + $0x20] sm:$0xff]  ;;  %v258_v54 = vld [vmem:[%s1973_s28 + $0x28] sm:$0xff] }
  0x77   : > { %1443 = vmatprep.subr.bf16.mxu0 %v1442_v21  ;;  %v259_v55 = vld [vmem:[%s1973_s28 + $0x30] sm:$0xff]  ;;  %v260_v56 = vld [vmem:[%s1973_s28 + $0x38] sm:$0xff]  ;;  %v261_v57 = vld [vmem:[%s1973_s28 + $0x40] sm:$0xff] }
  0x78   : > { %v262_v58 = vld [vmem:[%s1973_s28 + $0x48] sm:$0xff]  ;;  %v263_v59 = vld [vmem:[%s1973_s28 + $0x50] sm:$0xff]  ;;  %v264_v60 = vld [vmem:[%s1973_s28 + $0x58] sm:$0xff] }
  0x79   : > { %v265_v61 = vld [vmem:[%s1973_s28 + $0x60] sm:$0xff]  ;;  %v266_v62 = vld [vmem:[%s1973_s28 + $0x68] sm:$0xff]  ;;  %v267_v63 = vld [vmem:[%s1973_s28 + $0x70] sm:$0xff] }
  0x7a   : > { %1445 = vmatpush1.bf16.msra.mxu0 %v1444_v26  ;;  %v268_v1 = vld [vmem:[%s1973_s28 + $0x78] sm:$0xff]  ;;  %v2015_v2 = vld [vmem:[#allocation8] sm:$0xff]  ;;  %v2019_v11 = vld [vmem:[#allocation8 + $0x8] sm:$0xff] }
  0x7b   : > { %1447 = vmatprep.subr.bf16.mxu0 %v1446_v27  ;;  %1350 = vmatprep.mubr.msk.f32.mxu1 %vm468_vm0, %v2015_v2 }
  0x7e   : > { %1449 = vmatpush1.bf16.msra.mxu0 %v1448_v32 }
  0x7f   : > { %1451 = vmatprep.subr.bf16.mxu0 %v1450_v33 }
  0x82   : > { %1453 = vmatpush1.bf16.msra.mxu0 %v1452_v38 }
  0x83   : > { %1455 = vmatprep.subr.bf16.mxu0 %v1454_v39 }
  0x86   : > { %1457 = vmatpush1.bf16.msra.mxu0 %v1456_v44 }
  0x87   : > { %1459 = vmatprep.subr.bf16.mxu0 %v1458_v45 }
  0x8a   : > { %1461 = vmatpush1.bf16.msra.mxu0 %v1460_v48 }
  0x8d   : > { %334 = vmatmul.mubr.f32.vlgmr.msra.gmra.mrb[0].mxu0 %v253_v49 }
  0x8e   : > { %339 = vmatprep.mubr.f32.mxu0 %v1765_v0 }
  0x91   : > { %340 = vmatmul.mubr.f32.gmra.mrb[2].mxu0 %v254_v50 }
  0x92   : > { %345 = vmatprep.mubr.f32.mxu0 %v1765_v0 }
  0x95   : > { %346 = vmatmul.mubr.f32.gmra.mrb[4].mxu0 %v255_v51 }
  0x96   : > { %351 = vmatprep.mubr.f32.mxu0 %v1765_v0 }
  0x99   : > { %352 = vmatmul.mubr.f32.gmra.mrb[6].mxu0 %v256_v52 }
  0x9a   : > { %357 = vmatprep.mubr.f32.mxu0 %v1765_v0 }
  0x9d   : > { %358 = vmatmul.mubr.f32.gmra.mrb[8].mxu0 %v257_v53 }
  0x9e   : > { %363 = vmatprep.mubr.f32.mxu0 %v1765_v0 }
  0xa1   : > { %364 = vmatmul.mubr.f32.gmra.mrb[10].mxu0 %v258_v54 }
  0xa2   : > { %369 = vmatprep.mubr.f32.mxu0 %v1765_v0 }
  0xa5   : > { %370 = vmatmul.mubr.f32.gmra.mrb[12].mxu0 %v259_v55 }
  0xa6   : > { %375 = vmatprep.mubr.f32.mxu0 %v1765_v0 }
  0xa9   : > { %376 = vmatmul.mubr.f32.gmra.mrb[14].mxu0 %v260_v56 }
  0xaa   : > { %381 = vmatprep.mubr.f32.mxu0 %v1765_v0 }
  0xad   : > { %382 = vmatmul.mubr.f32.gmra.mrb[16].mxu0 %v261_v57 }
  0xae   : > { %387 = vmatprep.mubr.f32.mxu0 %v1765_v0 }
  0xb1   : > { %388 = vmatmul.mubr.f32.gmra.mrb[18].mxu0 %v262_v58 }
  0xb2   : > { %393 = vmatprep.mubr.f32.mxu0 %v1765_v0 }
  0xb5   : > { %394 = vmatmul.mubr.f32.gmra.mrb[20].mxu0 %v263_v59 }
  0xb6   : > { %399 = vmatprep.mubr.f32.mxu0 %v1765_v0 }
  0xb9   : > { %400 = vmatmul.mubr.f32.gmra.mrb[22].mxu0 %v264_v60 }
  0xba   : > { %405 = vmatprep.mubr.f32.mxu0 %v1765_v0 }
  0xbd   : > { %406 = vmatmul.mubr.f32.gmra.mrb[24].mxu0 %v265_v61 }
  0xbe   : > { %411 = vmatprep.mubr.f32.mxu0 %v1765_v0 }
  0xc1   : > { %412 = vmatmul.mubr.f32.gmra.mrb[26].mxu0 %v266_v62 }
  0xc2   : > { %417 = vmatprep.mubr.f32.mxu0 %v1765_v0 }
  0xc5   : > { %418 = vmatmul.mubr.f32.gmra.mrb[28].mxu0 %v267_v63 }
  0xc6   : > { %423 = vmatprep.mubr.f32.mxu0 %v1765_v0 }
  0xc9   : > { %424 = vmatmul.mubr.f32.gmra.mrb[30].mxu0 %v268_v1 }
 0x160   : > { %v335_v3 = vpop.f32.mrb[0].mxu0 }
 0x161   : > { %v337_v4 = vpop.f32.mrb[1].mxu0 }
 0x164   : > { %v341_v5 = vpop.f32.mrb[2].mxu0 }
 0x165   : > { %v1462_v6 = vpack.c.bf16 %v341_v5, %v335_v3  ;;  %v343_v7 = vpop.f32.mrb[3].mxu0 }
 0x166   : > { %v1466_v8 = vpack.c.bf16 %v343_v7, %v337_v4 }
 0x167   : > { %1463 = vmatprep.subr.bf16.mxu1 %v1462_v6 }
 0x168   : > { %v347_v9 = vpop.f32.mrb[4].mxu0  ;;  %1465 = vmatpush3.bf16.msra.mxu1 %v1462_v6 }
 0x169   : > { %v349_v10 = vpop.f32.mrb[5].mxu0  ;;  %1467 = vmatprep.subr.bf16.mxu1 %v1466_v8 }
 0x16c   : > { %v353_v0 = vpop.f32.mrb[6].mxu0  ;;  %1469 = vmatpush3.bf16.msra.mxu1 %v1466_v8 }
 0x16d   : > { %v1470_v12 = vpack.c.bf16 %v353_v0, %v347_v9  ;;  %v355_v13 = vpop.f32.mrb[7].mxu0 }
 0x16e   : > { %v1474_v14 = vpack.c.bf16 %v355_v13, %v349_v10 }
 0x16f   : > { %1351 = vmatmul.mubr.msk.f32.vlgmr.msra.gmra.mrb[0].mxu1 %vm468_vm0, %v2019_v11  ;;  %1471 = vmatprep.subr.bf16.mxu1 %v1470_v12 }
 0x170   : > { %v359_v15 = vpop.f32.mrb[8].mxu0  ;;  %1473 = vmatpush3.bf16.msra.mxu1 %v1470_v12  ;;  %1361 = vmatprep.mubr.msk.f32.mxu1 %vm468_vm0, %v2015_v2 }
 0x171   : > { %v361_v16 = vpop.f32.mrb[9].mxu0  ;;  %1475 = vmatprep.subr.bf16.mxu1 %v1474_v14 }
 0x174   : > { %v365_v17 = vpop.f32.mrb[10].mxu0  ;;  %1477 = vmatpush3.bf16.msra.mxu1 %v1474_v14 }
 0x175   : > { %v1478_v18 = vpack.c.bf16 %v365_v17, %v359_v15  ;;  %v367_v19 = vpop.f32.mrb[11].mxu0 }
 0x176   : > { %v1482_v20 = vpack.c.bf16 %v367_v19, %v361_v16 }
 0x177   : > { %1362 = vmatmul.mubr.msk.f32.vlgmr.msra.gmra.mrb[2].mxu1 %vm468_vm0, %v2019_v11  ;;  %1479 = vmatprep.subr.bf16.mxu1 %v1478_v18 }
 0x178   : > { %v371_v21 = vpop.f32.mrb[12].mxu0  ;;  %1481 = vmatpush3.bf16.msra.mxu1 %v1478_v18  ;;  %1372 = vmatprep.mubr.msk.f32.mxu1 %vm468_vm0, %v2015_v2 }
 0x179   : > { %v373_v22 = vpop.f32.mrb[13].mxu0  ;;  %1483 = vmatprep.subr.bf16.mxu1 %v1482_v20 }
 0x17c   : > { %v377_v23 = vpop.f32.mrb[14].mxu0  ;;  %1485 = vmatpush3.bf16.msra.mxu1 %v1482_v20 }
 0x17d   : > { %v1486_v24 = vpack.c.bf16 %v377_v23, %v371_v21  ;;  %v379_v25 = vpop.f32.mrb[15].mxu0 }
 0x17e   : > { %v1490_v26 = vpack.c.bf16 %v379_v25, %v373_v22 }
 0x17f   : > { %1373 = vmatmul.mubr.msk.f32.vlgmr.msra.gmra.mrb[4].mxu1 %vm468_vm0, %v2019_v11  ;;  %1487 = vmatprep.subr.bf16.mxu1 %v1486_v24 }
 0x180   : > { %v383_v27 = vpop.f32.mrb[16].mxu0  ;;  %1489 = vmatpush3.bf16.msra.mxu1 %v1486_v24  ;;  %1383 = vmatprep.mubr.msk.f32.mxu1 %vm468_vm0, %v2015_v2 }
 0x181   : > { %v385_v28 = vpop.f32.mrb[17].mxu0  ;;  %1491 = vmatprep.subr.bf16.mxu1 %v1490_v26 }
 0x184   : > { %v389_v29 = vpop.f32.mrb[18].mxu0  ;;  %1493 = vmatpush3.bf16.msra.mxu1 %v1490_v26 }
 0x185   : > { %v1494_v30 = vpack.c.bf16 %v389_v29, %v383_v27  ;;  %v391_v31 = vpop.f32.mrb[19].mxu0 }
 0x186   : > { %v1498_v32 = vpack.c.bf16 %v391_v31, %v385_v28 }
 0x187   : > { %1384 = vmatmul.mubr.msk.f32.vlgmr.msra.gmra.mrb[6].mxu1 %vm468_vm0, %v2019_v11  ;;  %1495 = vmatprep.subr.bf16.mxu1 %v1494_v30 }
 0x188   : > { %v395_v33 = vpop.f32.mrb[20].mxu0  ;;  %1497 = vmatpush3.bf16.msra.mxu1 %v1494_v30  ;;  %1394 = vmatprep.mubr.msk.f32.mxu1 %vm468_vm0, %v2015_v2 }
 0x189   : > { %v397_v34 = vpop.f32.mrb[21].mxu0  ;;  %1499 = vmatprep.subr.bf16.mxu1 %v1498_v32 }
 0x18c   : > { %v401_v35 = vpop.f32.mrb[22].mxu0  ;;  %1501 = vmatpush3.bf16.msra.mxu1 %v1498_v32 }
 0x18d   : > { %v1502_v36 = vpack.c.bf16 %v401_v35, %v395_v33  ;;  %v403_v37 = vpop.f32.mrb[23].mxu0 }
 0x18e   : > { %v1506_v38 = vpack.c.bf16 %v403_v37, %v397_v34 }
 0x18f   : > { %1395 = vmatmul.mubr.msk.f32.vlgmr.msra.gmra.mrb[8].mxu1 %vm468_vm0, %v2019_v11  ;;  %1503 = vmatprep.subr.bf16.mxu1 %v1502_v36 }
 0x190   : > { %v407_v39 = vpop.f32.mrb[24].mxu0  ;;  %1505 = vmatpush3.bf16.msra.mxu1 %v1502_v36  ;;  %1405 = vmatprep.mubr.msk.f32.mxu1 %vm468_vm0, %v2015_v2 }
 0x191   : > { %v409_v40 = vpop.f32.mrb[25].mxu0  ;;  %1507 = vmatprep.subr.bf16.mxu1 %v1506_v38 }
 0x194   : > { %v413_v41 = vpop.f32.mrb[26].mxu0  ;;  %1509 = vmatpush3.bf16.msra.mxu1 %v1506_v38 }
 0x195   : > { %v1510_v42 = vpack.c.bf16 %v413_v41, %v407_v39  ;;  %v415_v43 = vpop.f32.mrb[27].mxu0 }
 0x196   : > { %v1514_v44 = vpack.c.bf16 %v415_v43, %v409_v40 }
 0x197   : > { %1406 = vmatmul.mubr.msk.f32.vlgmr.msra.gmra.mrb[10].mxu1 %vm468_vm0, %v2019_v11  ;;  %1511 = vmatprep.subr.bf16.mxu1 %v1510_v42 }
 0x198   : > { %v419_v45 = vpop.f32.mrb[28].mxu0  ;;  %1513 = vmatpush3.bf16.msra.mxu1 %v1510_v42  ;;  %1416 = vmatprep.mubr.msk.f32.mxu1 %vm468_vm0, %v2015_v2 }
 0x199   : > { %v421_v46 = vpop.f32.mrb[29].mxu0  ;;  %1515 = vmatprep.subr.bf16.mxu1 %v1514_v44 }
 0x19c   : > { %v425_v47 = vpop.f32.mrb[30].mxu0  ;;  %1517 = vmatpush3.bf16.msra.mxu1 %v1514_v44 }
 0x19d   : > { %v1518_v48 = vpack.c.bf16 %v425_v47, %v419_v45  ;;  %v427_v49 = vpop.f32.mrb[31].mxu0 }
 0x19e   : > { %v1522_v50 = vpack.c.bf16 %v427_v49, %v421_v46 }
 0x19f   : > { %1417 = vmatmul.mubr.msk.f32.vlgmr.msra.gmra.mrb[12].mxu1 %vm468_vm0, %v2019_v11  ;;  %1519 = vmatprep.subr.bf16.mxu1 %v1518_v48 }
 0x1a0   : > { %1521 = vmatpush3.bf16.msra.mxu1 %v1518_v48  ;;  %1427 = vmatprep.mubr.msk.f32.mxu1 %vm468_vm0, %v2015_v2 }
 0x1a1   : > { %1523 = vmatprep.subr.bf16.mxu1 %v1522_v50 }
 0x1a4   : > { %1525 = vmatpush3.bf16.msra.mxu1 %v1522_v50 }
 0x1a7   : > { %1428 = vmatmul.mubr.msk.f32.vlgmr.msra.gmra.mrb[14].mxu1 %vm468_vm0, %v2019_v11 }
 0x242   : > { %v1352_v51 = vpop.f32.mrb[0].mxu1 }
 0x243   : > { %551 = vst [vmem:[%s2053_s18 + $0x8] sm:$0xff] %v1352_v51  ;;  %v541_v52 = vpop.f32.mrb[1].mxu1 }
 0x244   : > { %550 = vst [vmem:[%s2053_s18] sm:$0xff] %v541_v52 }
 0x24a   : > { %v1363_v53 = vpop.f32.mrb[2].mxu1 }
 0x24b   : > { %1259 = vst [vmem:[%s2053_s18 + $0x18] sm:$0xff] %v1363_v53  ;;  %v623_v54 = vpop.f32.mrb[3].mxu1 }
 0x24c   : > { %1258 = vst [vmem:[%s2053_s18 + $0x10] sm:$0xff] %v623_v54 }
 0x252   : > { %v1374_v55 = vpop.f32.mrb[4].mxu1 }
 0x253   : > { %1263 = vst [vmem:[%s2053_s18 + $0x28] sm:$0xff] %v1374_v55  ;;  %v706_v56 = vpop.f32.mrb[5].mxu1 }
 0x254   : > { %1262 = vst [vmem:[%s2053_s18 + $0x20] sm:$0xff] %v706_v56 }
 0x25a   : > { %v1385_v57 = vpop.f32.mrb[6].mxu1 }
 0x25b   : > { %1267 = vst [vmem:[%s2053_s18 + $0x38] sm:$0xff] %v1385_v57  ;;  %v789_v58 = vpop.f32.mrb[7].mxu1 }
 0x25c   : > { %1266 = vst [vmem:[%s2053_s18 + $0x30] sm:$0xff] %v789_v58 }
 0x262   : > { %v1396_v59 = vpop.f32.mrb[8].mxu1 }
 0x263   : > { %1271 = vst [vmem:[%s2053_s18 + $0x48] sm:$0xff] %v1396_v59  ;;  %v872_v60 = vpop.f32.mrb[9].mxu1 }
 0x264   : > { %1270 = vst [vmem:[%s2053_s18 + $0x40] sm:$0xff] %v872_v60 }
 0x26a   : > { %v1407_v61 = vpop.f32.mrb[10].mxu1 }
 0x26b   : > { %1275 = vst [vmem:[%s2053_s18 + $0x58] sm:$0xff] %v1407_v61  ;;  %v955_v62 = vpop.f32.mrb[11].mxu1 }
 0x26c   : > { %1274 = vst [vmem:[%s2053_s18 + $0x50] sm:$0xff] %v955_v62 }
 0x272   : > { %v1418_v63 = vpop.f32.mrb[12].mxu1 }
 0x273   : > { %1279 = vst [vmem:[%s2053_s18 + $0x68] sm:$0xff] %v1418_v63  ;;  %v1038_v1 = vpop.f32.mrb[13].mxu1 }
 0x274   : > { %1278 = vst [vmem:[%s2053_s18 + $0x60] sm:$0xff] %v1038_v1 }
 0x27a   : > { %v1429_v2 = vpop.f32.mrb[14].mxu1 }
 0x27b   : > { %1283 = vst [vmem:[%s2053_s18 + $0x78] sm:$0xff] %v1429_v2  ;;  %v1121_v3 = vpop.f32.mrb[15].mxu1 }
 0x27c   : > { %1282 = vst [vmem:[%s2053_s18 + $0x70] sm:$0xff] %v1121_v3 }
 0x27d   : > { %1699 = shalt.err (!%p1696_p2)
}
 0x27e   : > { %s1700_s10 = scalar_lea.hbm %s2074_s27, 2048  ;;  %s1704_s26 = scalar_lea.hbm %s2125_s3, 4096 }
 0x27f   : > { %p1701_p13 = scmp.ne.s32.totalorder %s2074_s27, %s1700_s10  ;;  %p1705_p4 = scmp.lt.u32.totalorder %s2074_s27, %s2125_s3 }
 0x280   : > { %p1706_p7 = scmp.lt.u32.totalorder %s1704_s26, %s1700_s10  ;;  %p1708_p11 = scmp.lt.u32.totalorder %s1700_s10, %s2074_s27 }
 0x281   : > { %p1702_p6 = pnand %p1701_p13, %p2139_p0 }
 0x282   : > { %p1707_p8 = por %p1706_p7, %p1705_p4 }
 0x283   : > { %p1703_p10 = pneg %p1702_p6 }
 0x284   : > { %p1709_p1 = por %p1708_p11, %p1707_p8 }
 0x286   : > { %p1710_p3 = pnand %p1709_p1, %p1703_p10 }
 0x288   : > { %1713 = shalt.err (!%p1710_p3)
}
 0x289   : > { %s1767_s28 = smov 128   ;;  %s1768_s18 = smov 8  }
 0x28a   : > { %1536 = dma.vmem_to_hbm [thread:$0]  (%p2139_p0), %s2076_s29, 2048, %s2074_s27, %s1134_s22, %s1767_s28, %s1767_s28, %s1768_s18  }
 0x28b PF: > { %s1163_s20 = sand.u32 1, %s1744_s12   ;;  %p2140_p5 = scmp.ne.s32.totalorder %s2130_s19, 0 }
 0x28c   : > { %p2141_p9 = scmp.ge.s32.totalorder %s1756_s15, 2  ;;  %s1164_s30 = scalar_lea.sflag [#allocation5], %s1163_s20 }
 0x28e   : > { %p1550_p12 = pnand %p2141_p9, %p2140_p5 }
 0x290   : > { %1739 = dma.done.wait (!%p1550_p12), %s1164_s30, 2048  }
 0x291   : > { %1741 = vsyncadd (!%p1550_p12), %s1164_s30, 4294965248  ;;  %p17_p2 = scmp.ge.s32.totalorder %s1902_s6, 4   ;;  %s2142_s12 = smov %s1748_s13 }
 0x292   : > { %s2143_s13 = smov %s1752_s14  ;;  %s2144_s14 = smov %s1911_s9 }
 0x293   : > { %s2145_s15 = smov %s1902_s6  ;;  %19 = sbr.rel (!%p17_p2) target bundleno = 6 (0x6), region = 99 }
 0x29a   :  { %1169 = vsyncpa [#allocation4], 1 }
 0x29b   :  { %1171 = vsyncpa [#allocation4 + $0x1], 1 }
 0x29c   :  { %1172 = vsyncpa [#allocation7], 1 }
 0x29d   :  { %1173 = vsyncpa [#allocation5], 1 }
 0x29e   :  { %1175 = vsyncpa [#allocation5 + $0x1], 1 }

</bundles_post_ra>
